<compile_context>
chip_gen: v6e
topology: v6e:2x2x1
jax: 0.10.0
libtpu: 0.0.40
codegen_flags: <defaults>
</compile_context>

<pallas_src>
import functools
import math

import jax
import jax.numpy as jnp
from jax.experimental import pallas as pl
from jax.experimental.pallas import tpu as pltpu


# ---------------------------------------------------------------------------
# Kernel 1: fused Q/K/V projections, head-major outputs, scale folded into Q.
# ---------------------------------------------------------------------------
def _qkv_proj_kernel(xq_ref, xk_ref, xv_ref,
                     wq_ref, bq_ref, wk_ref, bk_ref, wv_ref, bv_ref,
                     q_out, k_out, v_out, *, num_heads, scale):
    xq = xq_ref[0]      # (ts, D) in compute dtype
    xk = xk_ref[0]
    xv = xv_ref[0]
    # Statically unrolled loop over heads: per-head (ts, D) @ (D, d_k) MXU
    # matmuls with f32 accumulation; outputs written head-major, no reshapes.
    for h in range(num_heads):
        q = jnp.dot(xq, wq_ref[h], preferred_element_type=jnp.float32) + bq_ref[h]
        k = jnp.dot(xk, wk_ref[h], preferred_element_type=jnp.float32) + bk_ref[h]
        v = jnp.dot(xv, wv_ref[h], preferred_element_type=jnp.float32) + bv_ref[h]
        q_out[0, h] = (q * scale).astype(q_out.dtype)   # fold 1/sqrt(d_k) into Q
        k_out[0, h] = k.astype(k_out.dtype)
        v_out[0, h] = v.astype(v_out.dtype)


# ---------------------------------------------------------------------------
# Kernel 2: flash attention (online softmax over KV tiles) fused with the
#           output projection (accumulated over the head grid axis).
# ---------------------------------------------------------------------------
def _flash_attn_kernel(q_ref, k_ref, v_ref, wo_ref, bo_ref, o_ref,
                       m_sc, l_sc, acc_sc, out_acc, *, approx_recip):
    h = pl.program_id(2)
    kv = pl.program_id(3)
    nh = pl.num_programs(2)
    nkv = pl.num_programs(3)

    @pl.when(kv == 0)
    def _():
        m_sc[...] = jnp.full_like(m_sc, -jnp.inf)
        l_sc[...] = jnp.zeros_like(l_sc)
        acc_sc[...] = jnp.zeros_like(acc_sc)

    @pl.when((h == 0) & (kv == 0))
    def _():
        out_acc[...] = jnp.zeros_like(out_acc)

    q = q_ref[0, 0]          # (tq, d_k), pre-scaled by 1/sqrt(d_k)
    k = k_ref[0, 0]          # (tkv, d_k)
    v = v_ref[0, 0]          # (tkv, d_k)

    # scores = q @ k^T (contract over d_k), f32 accumulate on the MXU.
    s = jax.lax.dot_general(q, k, (((1,), (1,)), ((), ())),
                            preferred_element_type=jnp.float32)   # (tq, tkv)

    # Online softmax update (all in f32).
    m_prev = m_sc[...]
    m_new = jnp.maximum(m_prev, jnp.max(s, axis=-1, keepdims=True))
    alpha = jnp.exp(m_prev - m_new)
    p = jnp.exp(s - m_new)
    l_sc[...] = alpha * l_sc[...] + jnp.sum(p, axis=-1, keepdims=True)
    acc_sc[...] = alpha * acc_sc[...] + jnp.dot(
        p.astype(v.dtype), v, preferred_element_type=jnp.float32)
    m_sc[...] = m_new

    # TODO(synk): attn_mask / key_padding_mask not supported (unmasked attention).
    # TODO(synk): nn.Dropout(p=0.1) on p_attn is training-only; inference = identity.

    @pl.when(kv == nkv - 1)
    def _():
        inv_l = pl.reciprocal(l_sc[...], approx=approx_recip)     # EUP slot when approx
        ctx = acc_sc[...] * inv_l                                  # (tq, d_k) f32
        # Fused output projection: accumulate this head's contribution.
        out_acc[...] += jnp.dot(ctx.astype(wo_ref.dtype), wo_ref[0],
                                preferred_element_type=jnp.float32)

        @pl.when(h == nh - 1)
        def _():
            o_ref[0] = (out_acc[...] + bo_ref[...]).astype(o_ref.dtype)


# ---------------------------------------------------------------------------
# Wrapper
# ---------------------------------------------------------------------------
def multihead_attention(query, key, value, params, *, num_heads,
                        compute_dtype=jnp.bfloat16,
                        approx_softmax_recip=True,
                        max_seq_tile=256):
    """query/key/value: [B, S, D].  params: weights pre-transposed to
    [D_in, D_out] (so kernels compute x @ W + b), biases [1, D]."""
    B, S, D = query.shape
    assert key.shape == value.shape
    assert key.shape[0] == B and key.shape[2] == D
    # TODO(synk): fused QKV projection assumes equal query/key sequence lengths
    # (self-attention style); cross-attention with different lengths would need
    # a second projection grid.
    assert key.shape[1] == S
    assert D % num_heads == 0
    d_k = D // num_heads
    scale = 1.0 / math.sqrt(d_k)

    # --- host-side layout plumbing (cheap XLA ops, outside the kernels) ---
    def _split_w_in(w):   # [D, D] -> head-major [H, D, d_k]
        return w.reshape(D, num_heads, d_k).transpose(1, 0, 2).astype(compute_dtype)

    def _split_b_in(b):   # [1, D] -> [H, 1, d_k] (kept in f32, added post-accumulate)
        return b.reshape(num_heads, 1, d_k).astype(jnp.float32)

    wq_hm = _split_w_in(params["wq"])
    wk_hm = _split_w_in(params["wk"])
    wv_hm = _split_w_in(params["wv"])
    bq_hm = _split_b_in(params["bq"])
    bk_hm = _split_b_in(params["bk"])
    bv_hm = _split_b_in(params["bv"])
    wo_hm = params["wo"].reshape(num_heads, d_k, D).astype(compute_dtype)
    bo = params["bo"].reshape(1, D).astype(jnp.float32)

    xq = query.astype(compute_dtype)
    xk = key.astype(compute_dtype)
    xv = value.astype(compute_dtype)
    # TODO(synk): if query is key is value (self-attention), the activation could
    # be passed once to cut activation DMA traffic 3x.

    cbytes = jnp.dtype(compute_dtype).itemsize

    # ---------------- Q/K/V projection: grid (batch, seq-tiles) --------------
    ts = min(S, max_seq_tile)
    assert S % ts == 0, "sequence length must divide the projection tile size"
    ns = S // ts

    x_spec = pl.BlockSpec((1, ts, D), lambda b, si: (b, si, 0))
    w_in_spec = pl.BlockSpec((num_heads, D, d_k), lambda b, si: (0, 0, 0))
    b_in_spec = pl.BlockSpec((num_heads, 1, d_k), lambda b, si: (0, 0, 0))
    qkv_spec = pl.BlockSpec((1, num_heads, ts, d_k), lambda b, si: (b, 0, si, 0))

    proj_cost = pl.CostEstimate(
        flops=2 * 3 * B * S * D * D,
        transcendentals=0,
        bytes_accessed=(3 * B * S * D + 3 * D * D + 3 * B * S * D) * cbytes
                       + 3 * D * 4)

    q_hm, k_hm, v_hm = pl.pallas_call(
        functools.partial(_qkv_proj_kernel, num_heads=num_heads, scale=scale),
        out_shape=tuple(jax.ShapeDtypeStruct((B, num_heads, S, d_k), compute_dtype)
                        for _ in range(3)),
        grid_spec=pltpu.PrefetchScalarGridSpec(
            num_scalar_prefetch=0,
            grid=(B, ns),
            in_specs=[x_spec, x_spec, x_spec,
                      w_in_spec, b_in_spec,
                      w_in_spec, b_in_spec,
                      w_in_spec, b_in_spec],
            out_specs=[qkv_spec, qkv_spec, qkv_spec],
        ),
        compiler_params=pltpu.CompilerParams(
            dimension_semantics=("parallel", "parallel"),
            # Fine on v5e/v6e (128 MiB physical); lower to <=28 MiB on v7x.
            vmem_limit_bytes=64 * 1024 * 1024),
        cost_estimate=proj_cost,
    )(xq, xk, xv, wq_hm, bq_hm, wk_hm, bk_hm, wv_hm, bv_hm)

    # ------ flash attention + fused output projection: (B, nq, H, nkv) -------
    tq = min(S, max_seq_tile)
    tkv = min(S, max_seq_tile)
    assert S % tq == 0 and S % tkv == 0
    nq, nkv = S // tq, S // tkv

    q_spec = pl.BlockSpec((1, 1, tq, d_k), lambda b, qi, h, kv: (b, h, qi, 0))
    kv_spec = pl.BlockSpec((1, 1, tkv, d_k), lambda b, qi, h, kv: (b, h, kv, 0))
    wo_spec = pl.BlockSpec((1, d_k, D), lambda b, qi, h, kv: (h, 0, 0))
    bo_spec = pl.BlockSpec((1, D), lambda b, qi, h, kv: (0, 0))
    o_spec = pl.BlockSpec((1, tq, D), lambda b, qi, h, kv: (b, qi, 0))

    attn_cost = pl.CostEstimate(
        flops=2 * 2 * B * num_heads * S * S * d_k + 2 * B * S * D * D,
        transcendentals=B * num_heads * S * S,
        bytes_accessed=(3 * B * num_heads * S * d_k + num_heads * d_k * D) * cbytes
                       + (B * S * D + D) * 4)

    out = pl.pallas_call(
        functools.partial(_flash_attn_kernel, approx_recip=approx_softmax_recip),
        out_shape=jax.ShapeDtypeStruct((B, S, D), query.dtype),
        grid_spec=pltpu.PrefetchScalarGridSpec(
            num_scalar_prefetch=0,
            grid=(B, nq, num_heads, nkv),
            in_specs=[q_spec, kv_spec, kv_spec, wo_spec, bo_spec],
            out_specs=o_spec,
            scratch_shapes=[
                pltpu.VMEM((tq, 1), jnp.float32),     # running max  m
                pltpu.VMEM((tq, 1), jnp.float32),     # running sum  l
                pltpu.VMEM((tq, d_k), jnp.float32),   # unnormalized context acc
                pltpu.VMEM((tq, D), jnp.float32),     # fused output-projection acc
            ],
        ),
        compiler_params=pltpu.CompilerParams(
            dimension_semantics=("parallel", "parallel", "arbitrary", "arbitrary"),
            vmem_limit_bytes=64 * 1024 * 1024),
        cost_estimate=attn_cost,
    )(q_hm, k_hm, v_hm, wo_hm, bo)

    return out


# ---------------------------------------------------------------------------
# Pure-JAX reference (mirrors the PyTorch module, inference, f32)
# ---------------------------------------------------------------------------
def _reference(query, key, value, params, *, num_heads):
    B, S, D = query.shape
    d_k = D // num_heads

    def lin(x, w, b):
        return x @ w + b

    q = lin(query, params["wq"], params["bq"]).reshape(B, S, num_heads, d_k).transpose(0, 2, 1, 3)
    k = lin(key, params["wk"], params["bk"]).reshape(B, S, num_heads, d_k).transpose(0, 2, 1, 3)
    v = lin(value, params["wv"], params["bv"]).reshape(B, S, num_heads, d_k).transpose(0, 2, 1, 3)

    scores = jnp.einsum('bhqd,bhkd->bhqk', q, k) / math.sqrt(d_k)
    p = jax.nn.softmax(scores, axis=-1)
    x = jnp.einsum('bhqk,bhkd->bhqd', p, v)
    x = x.transpose(0, 2, 1, 3).reshape(B, S, D)
    return lin(x, params["wo"], params["bo"])


if __name__ == "__main__":
    # Small deterministic config: batch=2, seq=8, d_model=32, heads=4 (d_k=8).
    # NOTE: for real deployments D should be a multiple of 128 and d_k >= 128
    # (pad/pack heads) to keep lane-dense stores and a well-fed MXU.
    B, S, D, H = 2, 8, 32, 4

    key0 = jax.random.PRNGKey(0)
    keys = jax.random.split(key0, 12)

    bound = 1.0 / math.sqrt(D)

    def init_linear(kw, kb):
        w = jax.random.uniform(kw, (D, D), jnp.float32, -bound, bound)
        b = jax.random.uniform(kb, (1, D), jnp.float32, -bound, bound)
        return w, b

    wq, bq = init_linear(keys[0], keys[1])
    wk, bk = init_linear(keys[2], keys[3])
    wv, bv = init_linear(keys[4], keys[5])
    wo, bo = init_linear(keys[6], keys[7])
    params = dict(wq=wq, bq=bq, wk=wk, bk=bk, wv=wv, bv=bv, wo=wo, bo=bo)

    query = jax.random.normal(keys[8], (B, S, D), jnp.float32)
    key_ = jax.random.normal(keys[9], (B, S, D), jnp.float32)
    value = jax.random.normal(keys[10], (B, S, D), jnp.float32)

    ref = _reference(query, key_, value, params, num_heads=H)

    # Exact path: f32 MXU operands, exact softmax reciprocal.
    out_exact = multihead_attention(query, key_, value, params, num_heads=H,
                                    compute_dtype=jnp.float32,
                                    approx_softmax_recip=False)
    out_exact = jax.block_until_ready(out_exact)
    assert out_exact.shape == (B, S, D)
    assert jnp.allclose(out_exact, ref, atol=1e-4, rtol=1e-4), "exact-path mismatch"

    # Fast path: bf16 MXU operands (f32 accumulate / softmax), EUP approx recip.
    out_fast = multihead_attention(query, key_, value, params, num_heads=H,
                                   compute_dtype=jnp.bfloat16,
                                   approx_softmax_recip=True)
    out_fast = jax.block_until_ready(out_fast)
    assert out_fast.shape == (B, S, D)
    assert jnp.allclose(out_fast, ref, atol=2e-2, rtol=2e-2), "bf16-path mismatch"

    print("KERNEL_OK")
</pallas_src>

<mosaic_0001>
module attributes {stable_mosaic.version = 11 : i64} {
  func.func @_qkv_proj_kernel(%arg0: i32, %arg1: i32, %arg2: memref<1x8x32xf32, #tpu.memory_space<vmem>>, %arg3: memref<1x8x32xf32, #tpu.memory_space<vmem>>, %arg4: memref<1x8x32xf32, #tpu.memory_space<vmem>>, %arg5: memref<4x32x8xf32, #tpu.memory_space<vmem>>, %arg6: memref<4x1x8xf32, #tpu.memory_space<vmem>>, %arg7: memref<4x32x8xf32, #tpu.memory_space<vmem>>, %arg8: memref<4x1x8xf32, #tpu.memory_space<vmem>>, %arg9: memref<4x32x8xf32, #tpu.memory_space<vmem>>, %arg10: memref<4x1x8xf32, #tpu.memory_space<vmem>>, %arg11: memref<1x4x8x8xf32, #tpu.memory_space<vmem>>, %arg12: memref<1x4x8x8xf32, #tpu.memory_space<vmem>>, %arg13: memref<1x4x8x8xf32, #tpu.memory_space<vmem>>) attributes {dimension_semantics = [#tpu.dimension_semantics<parallel>, #tpu.dimension_semantics<parallel>], iteration_bounds = array<i64: 2, 1>, scalar_prefetch = 0 : i64, scratch_operands = 0 : i64, tpu.core_type = #tpu.core_type<tc>, window_params = [{transform_indices = @transform_0, window_bounds = array<i64: 1, 8, 32>}, {transform_indices = @transform_1, window_bounds = array<i64: 1, 8, 32>}, {transform_indices = @transform_2, window_bounds = array<i64: 1, 8, 32>}, {pipeline_mode = #tpu.pipeline_mode<synchronous>, transform_indices = @transform_3, window_bounds = array<i64: 4, 32, 8>}, {pipeline_mode = #tpu.pipeline_mode<synchronous>, transform_indices = @transform_4, window_bounds = array<i64: 4, 1, 8>}, {pipeline_mode = #tpu.pipeline_mode<synchronous>, transform_indices = @transform_5, window_bounds = array<i64: 4, 32, 8>}, {pipeline_mode = #tpu.pipeline_mode<synchronous>, transform_indices = @transform_6, window_bounds = array<i64: 4, 1, 8>}, {pipeline_mode = #tpu.pipeline_mode<synchronous>, transform_indices = @transform_7, window_bounds = array<i64: 4, 32, 8>}, {pipeline_mode = #tpu.pipeline_mode<synchronous>, transform_indices = @transform_8, window_bounds = array<i64: 4, 1, 8>}, {transform_indices = @transform_9, window_bounds = array<i64: 1, 4, 8, 8>}, {transform_indices = @transform_10, window_bounds = array<i64: 1, 4, 8, 8>}, {transform_indices = @transform_11, window_bounds = array<i64: 1, 4, 8, 8>}]} {
    %c0 = arith.constant 0 : index
    %c0_0 = arith.constant 0 : index
    %c0_1 = arith.constant 0 : index
    %0 = vector.load %arg2[%c0, %c0_0, %c0_1] : memref<1x8x32xf32, #tpu.memory_space<vmem>>, vector<1x8x32xf32>
    %1 = vector.shape_cast %0 : vector<1x8x32xf32> to vector<8x32xf32>
    %c0_2 = arith.constant 0 : index
    %c0_3 = arith.constant 0 : index
    %c0_4 = arith.constant 0 : index
    %2 = vector.load %arg3[%c0_2, %c0_3, %c0_4] : memref<1x8x32xf32, #tpu.memory_space<vmem>>, vector<1x8x32xf32>
    %3 = vector.shape_cast %2 : vector<1x8x32xf32> to vector<8x32xf32>
    %c0_5 = arith.constant 0 : index
    %c0_6 = arith.constant 0 : index
    %c0_7 = arith.constant 0 : index
    %4 = vector.load %arg4[%c0_5, %c0_6, %c0_7] : memref<1x8x32xf32, #tpu.memory_space<vmem>>, vector<1x8x32xf32>
    %5 = vector.shape_cast %4 : vector<1x8x32xf32> to vector<8x32xf32>
    %c0_8 = arith.constant 0 : index
    %c0_9 = arith.constant 0 : index
    %c0_10 = arith.constant 0 : index
    %6 = vector.load %arg5[%c0_8, %c0_9, %c0_10] : memref<4x32x8xf32, #tpu.memory_space<vmem>>, vector<1x32x8xf32>
    %7 = vector.shape_cast %6 : vector<1x32x8xf32> to vector<32x8xf32>
    %cst = arith.constant dense<0.000000e+00> : vector<8x8xf32>
    %8 = tpu.matmul %1, %7, %cst {dimension_numbers = #tpu.dot_dimension_numbers<[1], [0], [0], [1], [0, 0, 1, 1], [], []>} : vector<8x32xf32>, vector<32x8xf32>, vector<8x8xf32> -> vector<8x8xf32>
    %c0_11 = arith.constant 0 : index
    %c0_12 = arith.constant 0 : index
    %c0_13 = arith.constant 0 : index
    %9 = vector.load %arg6[%c0_11, %c0_12, %c0_13] : memref<4x1x8xf32, #tpu.memory_space<vmem>>, vector<1x1x8xf32>
    %10 = vector.shape_cast %9 : vector<1x1x8xf32> to vector<1x8xf32>
    %11 = vector.broadcast %10 : vector<1x8xf32> to vector<8x8xf32>
    %12 = arith.addf %8, %11 : vector<8x8xf32>
    %c0_14 = arith.constant 0 : index
    %c0_15 = arith.constant 0 : index
    %c0_16 = arith.constant 0 : index
    %13 = vector.load %arg7[%c0_14, %c0_15, %c0_16] : memref<4x32x8xf32, #tpu.memory_space<vmem>>, vector<1x32x8xf32>
    %14 = vector.shape_cast %13 : vector<1x32x8xf32> to vector<32x8xf32>
    %cst_17 = arith.constant dense<0.000000e+00> : vector<8x8xf32>
    %15 = tpu.matmul %3, %14, %cst_17 {dimension_numbers = #tpu.dot_dimension_numbers<[1], [0], [0], [1], [0, 0, 1, 1], [], []>} : vector<8x32xf32>, vector<32x8xf32>, vector<8x8xf32> -> vector<8x8xf32>
    %c0_18 = arith.constant 0 : index
    %c0_19 = arith.constant 0 : index
    %c0_20 = arith.constant 0 : index
    %16 = vector.load %arg8[%c0_18, %c0_19, %c0_20] : memref<4x1x8xf32, #tpu.memory_space<vmem>>, vector<1x1x8xf32>
    %17 = vector.shape_cast %16 : vector<1x1x8xf32> to vector<1x8xf32>
    %18 = vector.broadcast %17 : vector<1x8xf32> to vector<8x8xf32>
    %19 = arith.addf %15, %18 : vector<8x8xf32>
    %c0_21 = arith.constant 0 : index
    %c0_22 = arith.constant 0 : index
    %c0_23 = arith.constant 0 : index
    %20 = vector.load %arg9[%c0_21, %c0_22, %c0_23] : memref<4x32x8xf32, #tpu.memory_space<vmem>>, vector<1x32x8xf32>
    %21 = vector.shape_cast %20 : vector<1x32x8xf32> to vector<32x8xf32>
    %cst_24 = arith.constant dense<0.000000e+00> : vector<8x8xf32>
    %22 = tpu.matmul %5, %21, %cst_24 {dimension_numbers = #tpu.dot_dimension_numbers<[1], [0], [0], [1], [0, 0, 1, 1], [], []>} : vector<8x32xf32>, vector<32x8xf32>, vector<8x8xf32> -> vector<8x8xf32>
    %c0_25 = arith.constant 0 : index
    %c0_26 = arith.constant 0 : index
    %c0_27 = arith.constant 0 : index
    %23 = vector.load %arg10[%c0_25, %c0_26, %c0_27] : memref<4x1x8xf32, #tpu.memory_space<vmem>>, vector<1x1x8xf32>
    %24 = vector.shape_cast %23 : vector<1x1x8xf32> to vector<1x8xf32>
    %25 = vector.broadcast %24 : vector<1x8xf32> to vector<8x8xf32>
    %26 = arith.addf %22, %25 : vector<8x8xf32>
    %cst_28 = arith.constant 0.353553385 : f32
    %27 = vector.broadcast %cst_28 : f32 to vector<8x8xf32>
    %28 = arith.mulf %12, %27 : vector<8x8xf32>
    %c0_29 = arith.constant 0 : index
    %c0_30 = arith.constant 0 : index
    %c0_31 = arith.constant 0 : index
    %c0_32 = arith.constant 0 : index
    %29 = vector.load %arg11[%c0_29, %c0_30, %c0_31, %c0_32] : memref<1x4x8x8xf32, #tpu.memory_space<vmem>>, vector<1x1x8x8xf32>
    %30 = vector.shape_cast %29 : vector<1x1x8x8xf32> to vector<8x8xf32>
    %31 = vector.shape_cast %28 : vector<8x8xf32> to vector<1x1x8x8xf32>
    tpu.vector_store %arg11[%c0_29, %c0_30, %c0_31, %c0_32], %31 {strides = array<i32>} : memref<1x4x8x8xf32, #tpu.memory_space<vmem>>, vector<1x1x8x8xf32>,
    %c0_33 = arith.constant 0 : index
    %c0_34 = arith.constant 0 : index
    %c0_35 = arith.constant 0 : index
    %c0_36 = arith.constant 0 : index
    %32 = vector.load %arg12[%c0_33, %c0_34, %c0_35, %c0_36] : memref<1x4x8x8xf32, #tpu.memory_space<vmem>>, vector<1x1x8x8xf32>
    %33 = vector.shape_cast %32 : vector<1x1x8x8xf32> to vector<8x8xf32>
    %34 = vector.shape_cast %19 : vector<8x8xf32> to vector<1x1x8x8xf32>
    tpu.vector_store %arg12[%c0_33, %c0_34, %c0_35, %c0_36], %34 {strides = array<i32>} : memref<1x4x8x8xf32, #tpu.memory_space<vmem>>, vector<1x1x8x8xf32>,
    %c0_37 = arith.constant 0 : index
    %c0_38 = arith.constant 0 : index
    %c0_39 = arith.constant 0 : index
    %c0_40 = arith.constant 0 : index
    %35 = vector.load %arg13[%c0_37, %c0_38, %c0_39, %c0_40] : memref<1x4x8x8xf32, #tpu.memory_space<vmem>>, vector<1x1x8x8xf32>
    %36 = vector.shape_cast %35 : vector<1x1x8x8xf32> to vector<8x8xf32>
    %37 = vector.shape_cast %26 : vector<8x8xf32> to vector<1x1x8x8xf32>
    tpu.vector_store %arg13[%c0_37, %c0_38, %c0_39, %c0_40], %37 {strides = array<i32>} : memref<1x4x8x8xf32, #tpu.memory_space<vmem>>, vector<1x1x8x8xf32>,
    %c1 = arith.constant 1 : index
    %c0_41 = arith.constant 0 : index
    %c0_42 = arith.constant 0 : index
    %38 = vector.load %arg5[%c1, %c0_41, %c0_42] : memref<4x32x8xf32, #tpu.memory_space<vmem>>, vector<1x32x8xf32>
    %39 = vector.shape_cast %38 : vector<1x32x8xf32> to vector<32x8xf32>
    %cst_43 = arith.constant dense<0.000000e+00> : vector<8x8xf32>
    %40 = tpu.matmul %1, %39, %cst_43 {dimension_numbers = #tpu.dot_dimension_numbers<[1], [0], [0], [1], [0, 0, 1, 1], [], []>} : vector<8x32xf32>, vector<32x8xf32>, vector<8x8xf32> -> vector<8x8xf32>
    %c1_44 = arith.constant 1 : index
    %c0_45 = arith.constant 0 : index
    %c0_46 = arith.constant 0 : index
    %41 = vector.load %arg6[%c1_44, %c0_45, %c0_46] : memref<4x1x8xf32, #tpu.memory_space<vmem>>, vector<1x1x8xf32>
    %42 = vector.shape_cast %41 : vector<1x1x8xf32> to vector<1x8xf32>
    %43 = vector.broadcast %42 : vector<1x8xf32> to vector<8x8xf32>
    %44 = arith.addf %40, %43 : vector<8x8xf32>
    %c1_47 = arith.constant 1 : index
    %c0_48 = arith.constant 0 : index
    %c0_49 = arith.constant 0 : index
    %45 = vector.load %arg7[%c1_47, %c0_48, %c0_49] : memref<4x32x8xf32, #tpu.memory_space<vmem>>, vector<1x32x8xf32>
    %46 = vector.shape_cast %45 : vector<1x32x8xf32> to vector<32x8xf32>
    %cst_50 = arith.constant dense<0.000000e+00> : vector<8x8xf32>
    %47 = tpu.matmul %3, %46, %cst_50 {dimension_numbers = #tpu.dot_dimension_numbers<[1], [0], [0], [1], [0, 0, 1, 1], [], []>} : vector<8x32xf32>, vector<32x8xf32>, vector<8x8xf32> -> vector<8x8xf32>
    %c1_51 = arith.constant 1 : index
    %c0_52 = arith.constant 0 : index
    %c0_53 = arith.constant 0 : index
    %48 = vector.load %arg8[%c1_51, %c0_52, %c0_53] : memref<4x1x8xf32, #tpu.memory_space<vmem>>, vector<1x1x8xf32>
    %49 = vector.shape_cast %48 : vector<1x1x8xf32> to vector<1x8xf32>
    %50 = vector.broadcast %49 : vector<1x8xf32> to vector<8x8xf32>
    %51 = arith.addf %47, %50 : vector<8x8xf32>
    %c1_54 = arith.constant 1 : index
    %c0_55 = arith.constant 0 : index
    %c0_56 = arith.constant 0 : index
    %52 = vector.load %arg9[%c1_54, %c0_55, %c0_56] : memref<4x32x8xf32, #tpu.memory_space<vmem>>, vector<1x32x8xf32>
    %53 = vector.shape_cast %52 : vector<1x32x8xf32> to vector<32x8xf32>
    %cst_57 = arith.constant dense<0.000000e+00> : vector<8x8xf32>
    %54 = tpu.matmul %5, %53, %cst_57 {dimension_numbers = #tpu.dot_dimension_numbers<[1], [0], [0], [1], [0, 0, 1, 1], [], []>} : vector<8x32xf32>, vector<32x8xf32>, vector<8x8xf32> -> vector<8x8xf32>
    %c1_58 = arith.constant 1 : index
    %c0_59 = arith.constant 0 : index
    %c0_60 = arith.constant 0 : index
    %55 = vector.load %arg10[%c1_58, %c0_59, %c0_60] : memref<4x1x8xf32, #tpu.memory_space<vmem>>, vector<1x1x8xf32>
    %56 = vector.shape_cast %55 : vector<1x1x8xf32> to vector<1x8xf32>
    %57 = vector.broadcast %56 : vector<1x8xf32> to vector<8x8xf32>
    %58 = arith.addf %54, %57 : vector<8x8xf32>
    %cst_61 = arith.constant 0.353553385 : f32
    %59 = vector.broadcast %cst_61 : f32 to vector<8x8xf32>
    %60 = arith.mulf %44, %59 : vector<8x8xf32>
    %c0_62 = arith.constant 0 : index
    %c1_63 = arith.constant 1 : index
    %c0_64 = arith.constant 0 : index
    %c0_65 = arith.constant 0 : index
    %61 = vector.load %arg11[%c0_62, %c1_63, %c0_64, %c0_65] : memref<1x4x8x8xf32, #tpu.memory_space<vmem>>, vector<1x1x8x8xf32>
    %62 = vector.shape_cast %61 : vector<1x1x8x8xf32> to vector<8x8xf32>
    %63 = vector.shape_cast %60 : vector<8x8xf32> to vector<1x1x8x8xf32>
    tpu.vector_store %arg11[%c0_62, %c1_63, %c0_64, %c0_65], %63 {strides = array<i32>} : memref<1x4x8x8xf32, #tpu.memory_space<vmem>>, vector<1x1x8x8xf32>,
    %c0_66 = arith.constant 0 : index
    %c1_67 = arith.constant 1 : index
    %c0_68 = arith.constant 0 : index
    %c0_69 = arith.constant 0 : index
    %64 = vector.load %arg12[%c0_66, %c1_67, %c0_68, %c0_69] : memref<1x4x8x8xf32, #tpu.memory_space<vmem>>, vector<1x1x8x8xf32>
    %65 = vector.shape_cast %64 : vector<1x1x8x8xf32> to vector<8x8xf32>
    %66 = vector.shape_cast %51 : vector<8x8xf32> to vector<1x1x8x8xf32>
    tpu.vector_store %arg12[%c0_66, %c1_67, %c0_68, %c0_69], %66 {strides = array<i32>} : memref<1x4x8x8xf32, #tpu.memory_space<vmem>>, vector<1x1x8x8xf32>,
    %c0_70 = arith.constant 0 : index
    %c1_71 = arith.constant 1 : index
    %c0_72 = arith.constant 0 : index
    %c0_73 = arith.constant 0 : index
    %67 = vector.load %arg13[%c0_70, %c1_71, %c0_72, %c0_73] : memref<1x4x8x8xf32, #tpu.memory_space<vmem>>, vector<1x1x8x8xf32>
    %68 = vector.shape_cast %67 : vector<1x1x8x8xf32> to vector<8x8xf32>
    %69 = vector.shape_cast %58 : vector<8x8xf32> to vector<1x1x8x8xf32>
    tpu.vector_store %arg13[%c0_70, %c1_71, %c0_72, %c0_73], %69 {strides = array<i32>} : memref<1x4x8x8xf32, #tpu.memory_space<vmem>>, vector<1x1x8x8xf32>,
    %c2 = arith.constant 2 : index
    %c0_74 = arith.constant 0 : index
    %c0_75 = arith.constant 0 : index
    %70 = vector.load %arg5[%c2, %c0_74, %c0_75] : memref<4x32x8xf32, #tpu.memory_space<vmem>>, vector<1x32x8xf32>
    %71 = vector.shape_cast %70 : vector<1x32x8xf32> to vector<32x8xf32>
    %cst_76 = arith.constant dense<0.000000e+00> : vector<8x8xf32>
    %72 = tpu.matmul %1, %71, %cst_76 {dimension_numbers = #tpu.dot_dimension_numbers<[1], [0], [0], [1], [0, 0, 1, 1], [], []>} : vector<8x32xf32>, vector<32x8xf32>, vector<8x8xf32> -> vector<8x8xf32>
    %c2_77 = arith.constant 2 : index
    %c0_78 = arith.constant 0 : index
    %c0_79 = arith.constant 0 : index
    %73 = vector.load %arg6[%c2_77, %c0_78, %c0_79] : memref<4x1x8xf32, #tpu.memory_space<vmem>>, vector<1x1x8xf32>
    %74 = vector.shape_cast %73 : vector<1x1x8xf32> to vector<1x8xf32>
    %75 = vector.broadcast %74 : vector<1x8xf32> to vector<8x8xf32>
    %76 = arith.addf %72, %75 : vector<8x8xf32>
    %c2_80 = arith.constant 2 : index
    %c0_81 = arith.constant 0 : index
    %c0_82 = arith.constant 0 : index
    %77 = vector.load %arg7[%c2_80, %c0_81, %c0_82] : memref<4x32x8xf32, #tpu.memory_space<vmem>>, vector<1x32x8xf32>
    %78 = vector.shape_cast %77 : vector<1x32x8xf32> to vector<32x8xf32>
    %cst_83 = arith.constant dense<0.000000e+00> : vector<8x8xf32>
    %79 = tpu.matmul %3, %78, %cst_83 {dimension_numbers = #tpu.dot_dimension_numbers<[1], [0], [0], [1], [0, 0, 1, 1], [], []>} : vector<8x32xf32>, vector<32x8xf32>, vector<8x8xf32> -> vector<8x8xf32>
    %c2_84 = arith.constant 2 : index
    %c0_85 = arith.constant 0 : index
    %c0_86 = arith.constant 0 : index
    %80 = vector.load %arg8[%c2_84, %c0_85, %c0_86] : memref<4x1x8xf32, #tpu.memory_space<vmem>>, vector<1x1x8xf32>
    %81 = vector.shape_cast %80 : vector<1x1x8xf32> to vector<1x8xf32>
    %82 = vector.broadcast %81 : vector<1x8xf32> to vector<8x8xf32>
    %83 = arith.addf %79, %82 : vector<8x8xf32>
    %c2_87 = arith.constant 2 : index
    %c0_88 = arith.constant 0 : index
    %c0_89 = arith.constant 0 : index
    %84 = vector.load %arg9[%c2_87, %c0_88, %c0_89] : memref<4x32x8xf32, #tpu.memory_space<vmem>>, vector<1x32x8xf32>
    %85 = vector.shape_cast %84 : vector<1x32x8xf32> to vector<32x8xf32>
    %cst_90 = arith.constant dense<0.000000e+00> : vector<8x8xf32>
    %86 = tpu.matmul %5, %85, %cst_90 {dimension_numbers = #tpu.dot_dimension_numbers<[1], [0], [0], [1], [0, 0, 1, 1], [], []>} : vector<8x32xf32>, vector<32x8xf32>, vector<8x8xf32> -> vector<8x8xf32>
    %c2_91 = arith.constant 2 : index
    %c0_92 = arith.constant 0 : index
    %c0_93 = arith.constant 0 : index
    %87 = vector.load %arg10[%c2_91, %c0_92, %c0_93] : memref<4x1x8xf32, #tpu.memory_space<vmem>>, vector<1x1x8xf32>
    %88 = vector.shape_cast %87 : vector<1x1x8xf32> to vector<1x8xf32>
    %89 = vector.broadcast %88 : vector<1x8xf32> to vector<8x8xf32>
    %90 = arith.addf %86, %89 : vector<8x8xf32>
    %cst_94 = arith.constant 0.353553385 : f32
    %91 = vector.broadcast %cst_94 : f32 to vector<8x8xf32>
    %92 = arith.mulf %76, %91 : vector<8x8xf32>
    %c0_95 = arith.constant 0 : index
    %c2_96 = arith.constant 2 : index
    %c0_97 = arith.constant 0 : index
    %c0_98 = arith.constant 0 : index
    %93 = vector.load %arg11[%c0_95, %c2_96, %c0_97, %c0_98] : memref<1x4x8x8xf32, #tpu.memory_space<vmem>>, vector<1x1x8x8xf32>
    %94 = vector.shape_cast %93 : vector<1x1x8x8xf32> to vector<8x8xf32>
    %95 = vector.shape_cast %92 : vector<8x8xf32> to vector<1x1x8x8xf32>
    tpu.vector_store %arg11[%c0_95, %c2_96, %c0_97, %c0_98], %95 {strides = array<i32>} : memref<1x4x8x8xf32, #tpu.memory_space<vmem>>, vector<1x1x8x8xf32>,
    %c0_99 = arith.constant 0 : index
    %c2_100 = arith.constant 2 : index
    %c0_101 = arith.constant 0 : index
    %c0_102 = arith.constant 0 : index
    %96 = vector.load %arg12[%c0_99, %c2_100, %c0_101, %c0_102] : memref<1x4x8x8xf32, #tpu.memory_space<vmem>>, vector<1x1x8x8xf32>
    %97 = vector.shape_cast %96 : vector<1x1x8x8xf32> to vector<8x8xf32>
    %98 = vector.shape_cast %83 : vector<8x8xf32> to vector<1x1x8x8xf32>
    tpu.vector_store %arg12[%c0_99, %c2_100, %c0_101, %c0_102], %98 {strides = array<i32>} : memref<1x4x8x8xf32, #tpu.memory_space<vmem>>, vector<1x1x8x8xf32>,
    %c0_103 = arith.constant 0 : index
    %c2_104 = arith.constant 2 : index
    %c0_105 = arith.constant 0 : index
    %c0_106 = arith.constant 0 : index
    %99 = vector.load %arg13[%c0_103, %c2_104, %c0_105, %c0_106] : memref<1x4x8x8xf32, #tpu.memory_space<vmem>>, vector<1x1x8x8xf32>
    %100 = vector.shape_cast %99 : vector<1x1x8x8xf32> to vector<8x8xf32>
    %101 = vector.shape_cast %90 : vector<8x8xf32> to vector<1x1x8x8xf32>
    tpu.vector_store %arg13[%c0_103, %c2_104, %c0_105, %c0_106], %101 {strides = array<i32>} : memref<1x4x8x8xf32, #tpu.memory_space<vmem>>, vector<1x1x8x8xf32>,
    %c3 = arith.constant 3 : index
    %c0_107 = arith.constant 0 : index
    %c0_108 = arith.constant 0 : index
    %102 = vector.load %arg5[%c3, %c0_107, %c0_108] : memref<4x32x8xf32, #tpu.memory_space<vmem>>, vector<1x32x8xf32>
    %103 = vector.shape_cast %102 : vector<1x32x8xf32> to vector<32x8xf32>
    %cst_109 = arith.constant dense<0.000000e+00> : vector<8x8xf32>
    %104 = tpu.matmul %1, %103, %cst_109 {dimension_numbers = #tpu.dot_dimension_numbers<[1], [0], [0], [1], [0, 0, 1, 1], [], []>} : vector<8x32xf32>, vector<32x8xf32>, vector<8x8xf32> -> vector<8x8xf32>
    %c3_110 = arith.constant 3 : index
    %c0_111 = arith.constant 0 : index
    %c0_112 = arith.constant 0 : index
    %105 = vector.load %arg6[%c3_110, %c0_111, %c0_112] : memref<4x1x8xf32, #tpu.memory_space<vmem>>, vector<1x1x8xf32>
    %106 = vector.shape_cast %105 : vector<1x1x8xf32> to vector<1x8xf32>
    %107 = vector.broadcast %106 : vector<1x8xf32> to vector<8x8xf32>
    %108 = arith.addf %104, %107 : vector<8x8xf32>
    %c3_113 = arith.constant 3 : index
    %c0_114 = arith.constant 0 : index
    %c0_115 = arith.constant 0 : index
    %109 = vector.load %arg7[%c3_113, %c0_114, %c0_115] : memref<4x32x8xf32, #tpu.memory_space<vmem>>, vector<1x32x8xf32>
    %110 = vector.shape_cast %109 : vector<1x32x8xf32> to vector<32x8xf32>
    %cst_116 = arith.constant dense<0.000000e+00> : vector<8x8xf32>
    %111 = tpu.matmul %3, %110, %cst_116 {dimension_numbers = #tpu.dot_dimension_numbers<[1], [0], [0], [1], [0, 0, 1, 1], [], []>} : vector<8x32xf32>, vector<32x8xf32>, vector<8x8xf32> -> vector<8x8xf32>
    %c3_117 = arith.constant 3 : index
    %c0_118 = arith.constant 0 : index
    %c0_119 = arith.constant 0 : index
    %112 = vector.load %arg8[%c3_117, %c0_118, %c0_119] : memref<4x1x8xf32, #tpu.memory_space<vmem>>, vector<1x1x8xf32>
    %113 = vector.shape_cast %112 : vector<1x1x8xf32> to vector<1x8xf32>
    %114 = vector.broadcast %113 : vector<1x8xf32> to vector<8x8xf32>
    %115 = arith.addf %111, %114 : vector<8x8xf32>
    %c3_120 = arith.constant 3 : index
    %c0_121 = arith.constant 0 : index
    %c0_122 = arith.constant 0 : index
    %116 = vector.load %arg9[%c3_120, %c0_121, %c0_122] : memref<4x32x8xf32, #tpu.memory_space<vmem>>, vector<1x32x8xf32>
    %117 = vector.shape_cast %116 : vector<1x32x8xf32> to vector<32x8xf32>
    %cst_123 = arith.constant dense<0.000000e+00> : vector<8x8xf32>
    %118 = tpu.matmul %5, %117, %cst_123 {dimension_numbers = #tpu.dot_dimension_numbers<[1], [0], [0], [1], [0, 0, 1, 1], [], []>} : vector<8x32xf32>, vector<32x8xf32>, vector<8x8xf32> -> vector<8x8xf32>
    %c3_124 = arith.constant 3 : index
    %c0_125 = arith.constant 0 : index
    %c0_126 = arith.constant 0 : index
    %119 = vector.load %arg10[%c3_124, %c0_125, %c0_126] : memref<4x1x8xf32, #tpu.memory_space<vmem>>, vector<1x1x8xf32>
    %120 = vector.shape_cast %119 : vector<1x1x8xf32> to vector<1x8xf32>
    %121 = vector.broadcast %120 : vector<1x8xf32> to vector<8x8xf32>
    %122 = arith.addf %118, %121 : vector<8x8xf32>
    %cst_127 = arith.constant 0.353553385 : f32
    %123 = vector.broadcast %cst_127 : f32 to vector<8x8xf32>
    %124 = arith.mulf %108, %123 : vector<8x8xf32>
    %c0_128 = arith.constant 0 : index
    %c3_129 = arith.constant 3 : index
    %c0_130 = arith.constant 0 : index
    %c0_131 = arith.constant 0 : index
    %125 = vector.load %arg11[%c0_128, %c3_129, %c0_130, %c0_131] : memref<1x4x8x8xf32, #tpu.memory_space<vmem>>, vector<1x1x8x8xf32>
    %126 = vector.shape_cast %125 : vector<1x1x8x8xf32> to vector<8x8xf32>
    %127 = vector.shape_cast %124 : vector<8x8xf32> to vector<1x1x8x8xf32>
    tpu.vector_store %arg11[%c0_128, %c3_129, %c0_130, %c0_131], %127 {strides = array<i32>} : memref<1x4x8x8xf32, #tpu.memory_space<vmem>>, vector<1x1x8x8xf32>,
    %c0_132 = arith.constant 0 : index
    %c3_133 = arith.constant 3 : index
    %c0_134 = arith.constant 0 : index
    %c0_135 = arith.constant 0 : index
    %128 = vector.load %arg12[%c0_132, %c3_133, %c0_134, %c0_135] : memref<1x4x8x8xf32, #tpu.memory_space<vmem>>, vector<1x1x8x8xf32>
    %129 = vector.shape_cast %128 : vector<1x1x8x8xf32> to vector<8x8xf32>
    %130 = vector.shape_cast %115 : vector<8x8xf32> to vector<1x1x8x8xf32>
    tpu.vector_store %arg12[%c0_132, %c3_133, %c0_134, %c0_135], %130 {strides = array<i32>} : memref<1x4x8x8xf32, #tpu.memory_space<vmem>>, vector<1x1x8x8xf32>,
    %c0_136 = arith.constant 0 : index
    %c3_137 = arith.constant 3 : index
    %c0_138 = arith.constant 0 : index
    %c0_139 = arith.constant 0 : index
    %131 = vector.load %arg13[%c0_136, %c3_137, %c0_138, %c0_139] : memref<1x4x8x8xf32, #tpu.memory_space<vmem>>, vector<1x1x8x8xf32>
    %132 = vector.shape_cast %131 : vector<1x1x8x8xf32> to vector<8x8xf32>
    %133 = vector.shape_cast %122 : vector<8x8xf32> to vector<1x1x8x8xf32>
    tpu.vector_store %arg13[%c0_136, %c3_137, %c0_138, %c0_139], %133 {strides = array<i32>} : memref<1x4x8x8xf32, #tpu.memory_space<vmem>>, vector<1x1x8x8xf32>,
    return
  }
  func.func @transform_0(%arg0: i32, %arg1: i32) -> (i32, i32, i32) {
    %c0_i32 = arith.constant 0 : i32
    %c0_i32_0 = arith.constant 0 : i32
    return %arg0, %arg1, %c0_i32 : i32, i32, i32
  }
  func.func @transform_1(%arg0: i32, %arg1: i32) -> (i32, i32, i32) {
    %c0_i32 = arith.constant 0 : i32
    %c0_i32_0 = arith.constant 0 : i32
    return %arg0, %arg1, %c0_i32 : i32, i32, i32
  }
  func.func @transform_2(%arg0: i32, %arg1: i32) -> (i32, i32, i32) {
    %c0_i32 = arith.constant 0 : i32
    %c0_i32_0 = arith.constant 0 : i32
    return %arg0, %arg1, %c0_i32 : i32, i32, i32
  }
  func.func @transform_3(%arg0: i32, %arg1: i32) -> (i32, i32, i32) {
    %c0_i32 = arith.constant 0 : i32
    %c0_i32_0 = arith.constant 0 : i32
    %c0_i32_1 = arith.constant 0 : i32
    %c0_i32_2 = arith.constant 0 : i32
    return %c0_i32, %c0_i32_0, %c0_i32_1 : i32, i32, i32
  }
  func.func @transform_4(%arg0: i32, %arg1: i32) -> (i32, i32, i32) {
    %c0_i32 = arith.constant 0 : i32
    %c0_i32_0 = arith.constant 0 : i32
    %c0_i32_1 = arith.constant 0 : i32
    %c0_i32_2 = arith.constant 0 : i32
    return %c0_i32, %c0_i32_0, %c0_i32_1 : i32, i32, i32
  }
  func.func @transform_5(%arg0: i32, %arg1: i32) -> (i32, i32, i32) {
    %c0_i32 = arith.constant 0 : i32
    %c0_i32_0 = arith.constant 0 : i32
    %c0_i32_1 = arith.constant 0 : i32
    %c0_i32_2 = arith.constant 0 : i32
    return %c0_i32, %c0_i32_0, %c0_i32_1 : i32, i32, i32
  }
  func.func @transform_6(%arg0: i32, %arg1: i32) -> (i32, i32, i32) {
    %c0_i32 = arith.constant 0 : i32
    %c0_i32_0 = arith.constant 0 : i32
    %c0_i32_1 = arith.constant 0 : i32
    %c0_i32_2 = arith.constant 0 : i32
    return %c0_i32, %c0_i32_0, %c0_i32_1 : i32, i32, i32
  }
  func.func @transform_7(%arg0: i32, %arg1: i32) -> (i32, i32, i32) {
    %c0_i32 = arith.constant 0 : i32
    %c0_i32_0 = arith.constant 0 : i32
    %c0_i32_1 = arith.constant 0 : i32
    %c0_i32_2 = arith.constant 0 : i32
    return %c0_i32, %c0_i32_0, %c0_i32_1 : i32, i32, i32
  }
  func.func @transform_8(%arg0: i32, %arg1: i32) -> (i32, i32, i32) {
    %c0_i32 = arith.constant 0 : i32
    %c0_i32_0 = arith.constant 0 : i32
    %c0_i32_1 = arith.constant 0 : i32
    %c0_i32_2 = arith.constant 0 : i32
    return %c0_i32, %c0_i32_0, %c0_i32_1 : i32, i32, i32
  }
  func.func @transform_9(%arg0: i32, %arg1: i32) -> (i32, i32, i32, i32) {
    %c0_i32 = arith.constant 0 : i32
    %c0_i32_0 = arith.constant 0 : i32
    %c0_i32_1 = arith.constant 0 : i32
    return %arg0, %c0_i32, %arg1, %c0_i32_0 : i32, i32, i32, i32
  }
  func.func @transform_10(%arg0: i32, %arg1: i32) -> (i32, i32, i32, i32) {
    %c0_i32 = arith.constant 0 : i32
    %c0_i32_0 = arith.constant 0 : i32
    %c0_i32_1 = arith.constant 0 : i32
    return %arg0, %c0_i32, %arg1, %c0_i32_0 : i32, i32, i32, i32
  }
  func.func @transform_11(%arg0: i32, %arg1: i32) -> (i32, i32, i32, i32) {
    %c0_i32 = arith.constant 0 : i32
    %c0_i32_0 = arith.constant 0 : i32
    %c0_i32_1 = arith.constant 0 : i32
    return %arg0, %c0_i32, %arg1, %c0_i32_0 : i32, i32, i32, i32
  }
}

</mosaic_0001>

<bundles_post_ra>
// kernel: tpu_custom_call.1
= control target key start
LH: loop header
LB: loop body
LE: loop exit
PB: predicated region body
PF: predicated region fallthrough
CT: control target
= control target key end

     0   :  { %s2835_s0 = inlined_call_operand.vmem [shape: f32[2,8,32], index: 0, kind: input, shape index: {}]   ;;  %s2836_s1 = inlined_call_operand.vmem [shape: f32[2,8,32], index: 1, kind: input, shape index: {}]   ;;  %s2837_s2 = inlined_call_operand.vmem [shape: f32[2,8,32], index: 2, kind: input, shape index: {}]   ;;  %s2838_s3 = inlined_call_operand.vmem [shape: f32[4,32,8], index: 3, kind: input, shape index: {}]   ;;  %s2839_s4 = inlined_call_operand.vmem [shape: f32[4,1,8], index: 4, kind: input, shape index: {}]   ;;  %s2840_s5 = inlined_call_operand.vmem [shape: f32[4,32,8], index: 5, kind: input, shape index: {}]   ;;  %s2841_s6 = inlined_call_operand.vmem [shape: f32[4,1,8], index: 6, kind: input, shape index: {}]   ;;  %s2842_s7 = inlined_call_operand.vmem [shape: f32[4,32,8], index: 7, kind: input, shape index: {}]   ;;  %s2843_s8 = inlined_call_operand.vmem [shape: f32[4,1,8], index: 8, kind: input, shape index: {}]   ;;  %s2844_s9 = inlined_call_operand.hbm [shape: f32[2,4,8,8], index: 9, kind: output, shape index: {0}]   ;;  %s2845_s10 = inlined_call_operand.hbm [shape: f32[2,4,8,8], index: 10, kind: output, shape index: {1}]   ;;  %s2846_s11 = inlined_call_operand.hbm [shape: f32[2,4,8,8], index: 11, kind: output, shape index: {2}]  }
   0x1   :  { %2853 = sst [smem:[#allocation11_spill]] %s2835_s0 }
   0x2   :  { %2854 = sst [smem:[#allocation12_spill]] %s2836_s1 }
   0x3   :  { %2855 = sst [smem:[#allocation13_spill]] %s2837_s2 }
   0x4   :  { %2856 = sst [smem:[#allocation14_spill]] %s2838_s3 }
   0x5   :  { %17 = vsyncpa [#allocation3], 0 }
   0x6   :  { %19 = vsyncpa [#allocation3 + $0x1], 0 }
   0x7   :  { %20 = vsyncpa [#allocation5], 0 }
   0x8   :  { %22 = vsyncpa [#allocation5 + $0x1], 0  ;;  %s2308_s17 = smov 0   ;;  %s2310_s18 = smov 0  }
   0x9   :  { %s2312_s19 = smov 0   ;;  %s2314_s20 = smov 0  }
   0xa   :  { %s2316_s21 = smov 0   ;;  %s2318_s22 = smov 0  }
   0xb LB: > { %2857 = sst [smem:[#allocation9_spill]] %s2235_s21  ;;  %s2848_s23 = sadd.s32 4294967295, %s2239_s22   ;;  %s2239_s22 = sphi %s2318_s22, %s28_s22   ;;  %s2235_s21 = sphi %s2316_s21, %s2869_s21   ;;  %s2231_s20 = sphi %s2314_s20, %s2868_s20   ;;  %s2227_s19 = sphi %s2312_s19, %s2872_s19   ;;  %s2223_s18 = sphi %s2310_s18, %s2871_s18   ;;  %s2219_s17 = sphi %s2308_s17, %s2870_s17  }
   0xc   : > { %s2847_s24 = sadd.s32 4294967294, %s2239_s22   ;;  %s40_s25 = sadd.s32 1, %s2235_s21 }
   0xd   : > { %s259_s26 = sadd.s32 1, %s2227_s19  ;;  %p42_p0 = scmp.ge.s32.totalorder %s40_s25, 2 }
   0xe   : > { %p269_p1 = scmp.ne.s32.totalorder %s2227_s19, %s2223_s18  ;;  %p270_p2 = scmp.eq.s32.totalorder %s2848_s23, 1 }
   0xf   : > { %p275_p3 = scmp.ne.s32.totalorder %s2223_s18, %s2219_s17  ;;  %s2874_s25 = smov (%p42_p0, %s40_s25), 0 }
  0x10   : > { %2858 = sst [smem:[#allocation10_spill]] %s2874_s25  ;;  %p2350_p4 = por %p270_p2, %p269_p1 }
  0x11   : > { %p276_p5 = scmp.eq.s32.totalorder %s2847_s24, 1  ;;  %s254_s28 = ssub.s32 %s2235_s21, %s2874_s25 }
  0x12   : > { %p1747_p6 = scmp.ge.s32.totalorder %s2239_s22, 1  ;;  %p257_p7 = scmp.eq.s32.totalorder %s254_s28, 0 }
  0x13   : > { %p2359_p8 = por %p276_p5, %p275_p3  ;;  %p398_p9 = scmp.lt.s32.totalorder %s2239_s22, 3 }
  0x14   : > { %s2365_s30 = scalar_select %p257_p7, %s2227_s19, %s259_s26  }
  0x15   : > { %p399_p10 = pnand %p1747_p6, %p398_p9 }
  0x16   : > { %s2861_s3 = sld [smem:[#allocation14_spill]] (!%p399_p10)  ;;  %p464_p11 = scmp.lt.s32.totalorder (!%p399_p10), %s2231_s20, 1 }
  0x17   : > { %402 = sbr.rel (%p399_p10) target bundleno = 336 (0x150), region = 56  ;;  %s2862_s0 = sld [smem:[#allocation11_spill]] (!%p399_p10) }
  0x18   : > { %s2863_s1 = sld [smem:[#allocation12_spill]] (!%p399_p10)  ;;  %s447_s23 = sand.u32 (!%p399_p10), 1, %s2223_s18  }
  0x19   : > { %s2864_s2 = sld [smem:[#allocation13_spill]] (!%p399_p10)  ;;  %s1748_s15 = sshll.u32 (!%p399_p10), %s447_s23, 5 }
  0x1a   : > { %s2638_s26 = scalar_lea.vmem (!%p399_p10), [#allocation4], %s1748_s15  ;;  %s2642_s28 = scalar_lea.vmem (!%p399_p10), [#allocation2], %s1748_s15 }
  0x1c   : > { %v491_v0 = vld [vmem:[%s2861_s3 + $0x18] sm:$0xff]  ;;  %v2241_v2 = vmov 0.0   ;;  %v490_v3 = vld [vmem:[%s2861_s3 + $0x10] sm:$0xff]  ;;  %s465_s12 = scalar_select %p464_p11, %s2231_s20, 1  ;;  %v489_v5 = vld [vmem:[%s2861_s3 + $0x8] sm:$0xff]  ;;  %vm499_vm0 = vcmask 261120  }
  0x1d   : > { %v576_v1 = vld [vmem:[%s2840_s5 + $0x18] sm:$0xff]  ;;  %1906 = vmatprep.subr.mxu0 %v2241_v2  ;;  %1917 = vmatprep.subr.mxu1 %v2241_v2  ;;  %v575_v4 = vld [vmem:[%s2840_s5 + $0x10] sm:$0xff]  ;;  %v574_v6 = vld [vmem:[%s2840_s5 + $0x8] sm:$0xff]  ;;  %vm2242_vm1 = vmmov 0   ;;  %vm742_vm2 = vcmask 64512  }
  0x1e   : > { %1907 = vmatpush3.msra.mxu0 %v491_v0  ;;  %1918 = vmatpush3.msra.mxu1 %v576_v1  ;;  %s2391_s16 = sshll.u32 %s465_s12, 3  ;;  %v488_v7 = vld [vmem:[%s2861_s3] sm:$0xff]  ;;  %v660_v11 = vld [vmem:[%s2842_s7 + $0x18] sm:$0xff]  ;;  %v659_v13 = vld [vmem:[%s2842_s7 + $0x10] sm:$0xff]  ;;  %s2652_s12 = scalar_lea.vmem [#allocation6], %s1748_s15 }
  0x1f   : > { %1908 = vmatprep.subr.mxu0 %v2241_v2  ;;  %1919 = vmatprep.subr.mxu1 %v2241_v2  ;;  %s470_s14 = scalar_lea.vmem %s2862_s0, %s2391_s16  ;;  %s477_s25 = scalar_lea.vmem %s2863_s1, %s2391_s16  ;;  %v573_v8 = vld [vmem:[%s2840_s5] sm:$0xff]  ;;  %v1763_v12 = vld [vmem:[%s2861_s3 + $0x38] sm:$0xff]  ;;  %v1762_v14 = vld [vmem:[%s2861_s3 + $0x30] sm:$0xff] }
  0x20   : > { %1909 = vmatpush3.msra.mxu0 %v490_v3  ;;  %1920 = vmatpush3.msra.mxu1 %v575_v4  ;;  %v2411_v9 = vld [vmem:[%s470_s14] sm:$0xff]  ;;  %v658_v15 = vld [vmem:[%s2842_s7 + $0x8] sm:$0xff]  ;;  %v1770_v20 = vld [vmem:[%s2840_s5 + $0x38] sm:$0xff]  ;;  %s1539_s14 = sshll.u32 %s2642_s28, 4  ;;  %s2243_s15 = smov [#allocation2]   ;;  %s2688_s14 = int_to_ptr.vmem [resolvable:$true] %s1539_s14 }
  0x21   : > { %1910 = vmatprep.subr.mxu0 %v2241_v2  ;;  %1921 = vmatprep.subr.mxu1 %v2241_v2  ;;  %v2413_v10 = vld [vmem:[%s477_s25] sm:$0xff]  ;;  %v1761_v16 = vld [vmem:[%s2861_s3 + $0x28] sm:$0xff]  ;;  %s484_s25 = scalar_lea.vmem %s2864_s2, %s2391_s16  ;;  %v1777_v21 = vld [vmem:[%s2842_s7 + $0x38] sm:$0xff]  ;;  %s2686_s16 = sshll.u32 %s2231_s20, 9 }
  0x22   : > { %1911 = vmatpush3.msra.mxu0 %v489_v5  ;;  %1922 = vmatpush3.msra.mxu1 %v574_v6  ;;  %v657_v17 = vld [vmem:[%s2842_s7] sm:$0xff]  ;;  %v1769_v22 = vld [vmem:[%s2840_s5 + $0x30] sm:$0xff]  ;;  %v1768_v24 = vld [vmem:[%s2840_s5 + $0x28] sm:$0xff]  ;;  %s2702_s20 = scalar_lea.sflag [#allocation3], %s447_s23  ;;  %s2107_s13 = scalar_lea.vmem %s2688_s14, 512 }
  0x23   : > { %1912 = vmatprep.subr.mxu0 %v2241_v2  ;;  %1923 = vmatprep.subr.mxu1 %v2241_v2  ;;  %v1760_v18 = vld [vmem:[%s2861_s3 + $0x20] sm:$0xff]  ;;  %v1776_v23 = vld [vmem:[%s2842_s7 + $0x30] sm:$0xff]  ;;  %v1775_v25 = vld [vmem:[%s2842_s7 + $0x28] sm:$0xff]  ;;  %p2108_p12 = scmp.ne.s32.totalorder %s2688_s14, %s2107_s13  ;;  %s2111_s0 = sshll.u32 %s2243_s15, 4  ;;  %s2112_s0 = int_to_ptr.vmem [resolvable:$false] %s2111_s0 }
  0x24   : > { %1913 = vmatpush3.msra.mxu0 %v488_v7  ;;  %1914 = vmatprep.mubr.msk.f32.mxu0 %vm2242_vm1, %v2241_v2  ;;  %v2459_v19 = vld [vmem:[%s484_s25] sm:$0xff]  ;;  %v1787_v28 = vld [vmem:[%s2861_s3 + $0x58] sm:$0xff]  ;;  %v1786_v30 = vld [vmem:[%s2861_s3 + $0x50] sm:$0xff]  ;;  %s2696_s25 = scalar_lea.hbm %s2844_s9, %s2686_s16  ;;  %s2113_s1 = scalar_lea.vmem %s2112_s0, 1024 }
  0x25   : > { %1924 = vmatpush3.msra.mxu1 %v573_v8  ;;  %1925 = vmatprep.mubr.msk.f32.mxu1 %vm2242_vm1, %v2241_v2  ;;  %v1767_v26 = vld [vmem:[%s2840_s5 + $0x20] sm:$0xff]  ;;  %v1794_v29 = vld [vmem:[%s2840_s5 + $0x58] sm:$0xff]  ;;  %v1793_v31 = vld [vmem:[%s2840_s5 + $0x50] sm:$0xff]  ;;  %p2109_p13 = pnand %p2108_p12, %p2350_p4  ;;  %p2114_p1 = scmp.lt.s32.totalorder %s2688_s14, %s2112_s0 }
  0x26   : > { %1915 = vmatmul.mubr.msk.f32.vlgmr.msra.gmra.mxu0 %vm499_vm0, %v2411_v9  ;;  %1926 = vmatmul.mubr.msk.f32.vlgmr.msra.gmra.mxu1 %vm499_vm0, %v2413_v10  ;;  %v1774_v27 = vld [vmem:[%s2842_s7 + $0x20] sm:$0xff]  ;;  %v1785_v32 = vld [vmem:[%s2861_s3 + $0x48] sm:$0xff]  ;;  %v1801_v36 = vld [vmem:[%s2842_s7 + $0x58] sm:$0xff]  ;;  %p2115_p2 = scmp.lt.s32.totalorder %s2113_s1, %s2107_s13 }
  0x27   : > { %1928 = vmatprep.subr.mxu0 %v2241_v2  ;;  %1939 = vmatprep.subr.mxu1 %v2241_v2  ;;  %v1792_v33 = vld [vmem:[%s2840_s5 + $0x48] sm:$0xff]  ;;  %v1784_v34 = vld [vmem:[%s2861_s3 + $0x40] sm:$0xff]  ;;  %v1811_v37 = vld [vmem:[%s2861_s3 + $0x78] sm:$0xff]  ;;  %p2110_p0 = pneg %p2109_p13 }
  0x28   : > { %1929 = vmatpush3.msra.mxu0 %v660_v11  ;;  %1940 = vmatpush3.msra.mxu1 %v1763_v12  ;;  %v1791_v35 = vld [vmem:[%s2840_s5 + $0x40] sm:$0xff]  ;;  %v1800_v38 = vld [vmem:[%s2842_s7 + $0x50] sm:$0xff]  ;;  %v1799_v40 = vld [vmem:[%s2842_s7 + $0x48] sm:$0xff]  ;;  %p2116_p3 = por %p2115_p2, %p2114_p1 }
  0x29   : > { %1930 = vmatprep.subr.mxu0 %v2241_v2  ;;  %1941 = vmatprep.subr.mxu1 %v2241_v2  ;;  %v1810_v39 = vld [vmem:[%s2861_s3 + $0x70] sm:$0xff]  ;;  %v1809_v41 = vld [vmem:[%s2861_s3 + $0x68] sm:$0xff]  ;;  %v1798_v42 = vld [vmem:[%s2842_s7 + $0x40] sm:$0xff] }
  0x2a   : > { %1931 = vmatpush3.msra.mxu0 %v659_v13  ;;  %1942 = vmatpush3.msra.mxu1 %v1762_v14  ;;  %v1808_v43 = vld [vmem:[%s2861_s3 + $0x60] sm:$0xff]  ;;  %v1818_v44 = vld [vmem:[%s2840_s5 + $0x78] sm:$0xff]  ;;  %v1817_v46 = vld [vmem:[%s2840_s5 + $0x70] sm:$0xff]  ;;  %p2117_p5 = pnand %p2116_p3, %p2110_p0 }
  0x2b   : > { %1932 = vmatprep.subr.mxu0 %v2241_v2  ;;  %1943 = vmatprep.subr.mxu1 %v2241_v2  ;;  %v1825_v45 = vld [vmem:[%s2842_s7 + $0x78] sm:$0xff]  ;;  %v1824_v47 = vld [vmem:[%s2842_s7 + $0x70] sm:$0xff]  ;;  %v1816_v48 = vld [vmem:[%s2840_s5 + $0x68] sm:$0xff] }
  0x2c   : > { %1933 = vmatpush3.msra.mxu0 %v658_v15  ;;  %1944 = vmatpush3.msra.mxu1 %v1761_v16  ;;  %v1823_v49 = vld [vmem:[%s2842_s7 + $0x68] sm:$0xff]  ;;  %v1815_v50 = vld [vmem:[%s2840_s5 + $0x60] sm:$0xff] }
  0x2d   : > { %1934 = vmatprep.subr.mxu0 %v2241_v2  ;;  %1945 = vmatprep.subr.mxu1 %v2241_v2  ;;  %v1822_v51 = vld [vmem:[%s2842_s7 + $0x60] sm:$0xff] }
  0x2e   : > { %1935 = vmatpush3.msra.mxu0 %v657_v17  ;;  %1936 = vmatprep.mubr.msk.f32.mxu0 %vm2242_vm1, %v2241_v2  ;;  %v1754_v52 = vld [vmem:[%s2839_s4] ss:$0 sm:$0xff]  ;;  %v1765_v62 = vld [vmem:[%s2839_s4 + $0x1] ss:$0 sm:$0xff]  ;;  %v1789_v14 = vld [vmem:[%s2839_s4 + $0x2] ss:$0 sm:$0xff] }
  0x2f   : > { %1946 = vmatpush3.msra.mxu1 %v1760_v18  ;;  %1947 = vmatprep.mubr.msk.f32.mxu1 %vm2242_vm1, %v2241_v2  ;;  %v1756_v53 = vld [vmem:[%s2841_s6] ss:$0 sm:$0xff]  ;;  %v1772_v6 = vld [vmem:[%s2841_s6 + $0x1] ss:$0 sm:$0xff]  ;;  %v1796_v15 = vld [vmem:[%s2841_s6 + $0x2] ss:$0 sm:$0xff] }
  0x30   : > { %1937 = vmatmul.mubr.msk.f32.vlgmr.msra.gmra.mxu0 %vm499_vm0, %v2459_v19  ;;  %1948 = vmatmul.mubr.msk.f32.vlgmr.msra.gmra.mxu1 %vm499_vm0, %v2411_v9  ;;  %v1758_v61 = vld [vmem:[%s2843_s8] ss:$0 sm:$0xff]  ;;  %v1779_v7 = vld [vmem:[%s2843_s8 + $0x1] ss:$0 sm:$0xff] }
  0x31   : > { %1950 = vmatprep.subr.mxu0 %v2241_v2  ;;  %1961 = vmatprep.subr.mxu1 %v2241_v2 }
  0x32   : > { %1951 = vmatpush3.msra.mxu0 %v1770_v20  ;;  %1962 = vmatpush3.msra.mxu1 %v1777_v21 }
  0x33   : > { %1952 = vmatprep.subr.mxu0 %v2241_v2  ;;  %1963 = vmatprep.subr.mxu1 %v2241_v2 }
  0x34   : > { %1953 = vmatpush3.msra.mxu0 %v1769_v22  ;;  %1964 = vmatpush3.msra.mxu1 %v1776_v23  ;;  %v1803_v23 = vld [vmem:[%s2843_s8 + $0x2] ss:$0 sm:$0xff] }
  0x35   : > { %1954 = vmatprep.subr.mxu0 %v2241_v2  ;;  %1965 = vmatprep.subr.mxu1 %v2241_v2 }
  0x36   : > { %1955 = vmatpush3.msra.mxu0 %v1768_v24  ;;  %1966 = vmatpush3.msra.mxu1 %v1775_v25  ;;  %v1813_v24 = vld [vmem:[%s2839_s4 + $0x3] ss:$0 sm:$0xff] }
  0x37   : > { %1956 = vmatprep.subr.mxu0 %v2241_v2  ;;  %1967 = vmatprep.subr.mxu1 %v2241_v2 }
  0x38   : > { %1957 = vmatpush3.msra.mxu0 %v1767_v26  ;;  %1958 = vmatprep.mubr.msk.f32.mxu0 %vm2242_vm1, %v2241_v2 }
  0x39   : > { %1968 = vmatpush3.msra.mxu1 %v1774_v27  ;;  %1969 = vmatprep.mubr.msk.f32.mxu1 %vm2242_vm1, %v2241_v2 }
  0x3a   : > { %1959 = vmatmul.mubr.msk.f32.vlgmr.msra.gmra.mxu0 %vm499_vm0, %v2413_v10  ;;  %1970 = vmatmul.mubr.msk.f32.vlgmr.msra.gmra.mxu1 %vm499_vm0, %v2459_v19 }
  0x3b   : > { %1972 = vmatprep.subr.mxu0 %v2241_v2  ;;  %1983 = vmatprep.subr.mxu1 %v2241_v2 }
  0x3c   : > { %1973 = vmatpush3.msra.mxu0 %v1787_v28  ;;  %1984 = vmatpush3.msra.mxu1 %v1794_v29 }
  0x3d   : > { %1974 = vmatprep.subr.mxu0 %v2241_v2  ;;  %1985 = vmatprep.subr.mxu1 %v2241_v2 }
  0x3e   : > { %1975 = vmatpush3.msra.mxu0 %v1786_v30  ;;  %1986 = vmatpush3.msra.mxu1 %v1793_v31 }
  0x3f   : > { %1976 = vmatprep.subr.mxu0 %v2241_v2  ;;  %1987 = vmatprep.subr.mxu1 %v2241_v2 }
  0x40   : > { %1977 = vmatpush3.msra.mxu0 %v1785_v32  ;;  %1988 = vmatpush3.msra.mxu1 %v1792_v33 }
  0x41   : > { %1978 = vmatprep.subr.mxu0 %v2241_v2  ;;  %1989 = vmatprep.subr.mxu1 %v2241_v2 }
  0x42   : > { %1979 = vmatpush3.msra.mxu0 %v1784_v34  ;;  %1980 = vmatprep.mubr.msk.f32.mxu0 %vm2242_vm1, %v2241_v2 }
  0x43   : > { %1990 = vmatpush3.msra.mxu1 %v1791_v35  ;;  %1991 = vmatprep.mubr.msk.f32.mxu1 %vm2242_vm1, %v2241_v2 }
  0x44   : > { %1981 = vmatmul.mubr.msk.f32.vlgmr.msra.gmra.mxu0 %vm499_vm0, %v2411_v9  ;;  %1992 = vmatmul.mubr.msk.f32.vlgmr.msra.gmra.mxu1 %vm499_vm0, %v2413_v10 }
  0x45   : > { %1994 = vmatprep.subr.mxu0 %v2241_v2  ;;  %2005 = vmatprep.subr.mxu1 %v2241_v2 }
  0x46   : > { %1995 = vmatpush3.msra.mxu0 %v1801_v36  ;;  %2006 = vmatpush3.msra.mxu1 %v1811_v37 }
  0x47   : > { %1996 = vmatprep.subr.mxu0 %v2241_v2  ;;  %2007 = vmatprep.subr.mxu1 %v2241_v2 }
  0x48   : > { %1997 = vmatpush3.msra.mxu0 %v1800_v38  ;;  %2008 = vmatpush3.msra.mxu1 %v1810_v39 }
  0x49   : > { %1998 = vmatprep.subr.mxu0 %v2241_v2  ;;  %2009 = vmatprep.subr.mxu1 %v2241_v2 }
  0x4a   : > { %1999 = vmatpush3.msra.mxu0 %v1799_v40  ;;  %2010 = vmatpush3.msra.mxu1 %v1809_v41 }
  0x4b   : > { %2000 = vmatprep.subr.mxu0 %v2241_v2  ;;  %2011 = vmatprep.subr.mxu1 %v2241_v2 }
  0x4c   : > { %2001 = vmatpush3.msra.mxu0 %v1798_v42  ;;  %2002 = vmatprep.mubr.msk.f32.mxu0 %vm2242_vm1, %v2241_v2 }
  0x4d   : > { %2012 = vmatpush3.msra.mxu1 %v1808_v43  ;;  %2013 = vmatprep.mubr.msk.f32.mxu1 %vm2242_vm1, %v2241_v2 }
  0x4e   : > { %2003 = vmatmul.mubr.msk.f32.vlgmr.msra.gmra.mxu0 %vm499_vm0, %v2459_v19  ;;  %2014 = vmatmul.mubr.msk.f32.vlgmr.msra.gmra.mxu1 %vm499_vm0, %v2411_v9 }
  0x4f   : > { %2016 = vmatprep.subr.mxu0 %v2241_v2  ;;  %2027 = vmatprep.subr.mxu1 %v2241_v2 }
  0x50   : > { %2017 = vmatpush3.msra.mxu0 %v1818_v44  ;;  %2028 = vmatpush3.msra.mxu1 %v1825_v45 }
  0x51   : > { %2018 = vmatprep.subr.mxu0 %v2241_v2  ;;  %2029 = vmatprep.subr.mxu1 %v2241_v2 }
  0x52   : > { %2019 = vmatpush3.msra.mxu0 %v1817_v46  ;;  %2030 = vmatpush3.msra.mxu1 %v1824_v47 }
  0x53   : > { %2020 = vmatprep.subr.mxu0 %v2241_v2  ;;  %2031 = vmatprep.subr.mxu1 %v2241_v2 }
  0x54   : > { %2021 = vmatpush3.msra.mxu0 %v1816_v48  ;;  %2032 = vmatpush3.msra.mxu1 %v1823_v49 }
  0x55   : > { %2022 = vmatprep.subr.mxu0 %v2241_v2  ;;  %2033 = vmatprep.subr.mxu1 %v2241_v2 }
  0x56   : > { %2023 = vmatpush3.msra.mxu0 %v1815_v50  ;;  %2024 = vmatprep.mubr.msk.f32.mxu0 %vm2242_vm1, %v2241_v2 }
  0x57   : > { %2034 = vmatpush3.msra.mxu1 %v1822_v51  ;;  %2035 = vmatprep.mubr.msk.f32.mxu1 %vm2242_vm1, %v2241_v2 }
  0x58   : > { %2025 = vmatmul.mubr.msk.f32.vlgmr.msra.gmra.mxu0 %vm499_vm0, %v2413_v10  ;;  %2036 = vmatmul.mubr.msk.f32.vlgmr.msra.gmra.mxu1 %vm499_vm0, %v2459_v19 }
  0xe6   : > { %v569_v54 = vpop.f32.mrf.mxu0  ;;  %v653_v55 = vpop.f32.mrf.mxu1 }
  0xe7   : > { %v570_v56 = vadd.f32 %v1754_v52, %v569_v54  ;;  %v654_v57 = vadd.f32 %v1756_v53, %v653_v55 }
  0xe8   : > { %v1916_v58 = vpop.f32.mrf.mxu0  ;;  %v1927_v59 = vpop.f32.mrf.mxu1 }
  0xe9   : > { %v741_v60 = vmul.f32 0.35355338, %v570_v56  ;;  %744 = vst.msk [vmem:[%s2638_s26] sm:$0xff] %vm742_vm2, %v654_v57 }
  0xeb   : > { %743 = vst.msk [vmem:[%s2642_s28] sm:$0xff] %vm742_vm2, %v741_v60 }
  0xf0   : > { %v737_v63 = vpop.f32.mrf.mxu0  ;;  %v825_v0 = vpop.f32.mrf.mxu1 }
  0xf1   : > { %v738_v1 = vadd.f32 %v1758_v61, %v737_v63  ;;  %v826_v2 = vadd.f32 %v1765_v62, %v825_v0 }
  0xf2   : > { %v1938_v3 = vpop.f32.mrf.mxu0  ;;  %v1949_v4 = vpop.f32.mrf.mxu1 }
  0xf3   : > { %745 = vst.msk [vmem:[%s2652_s12] sm:$0xff] %vm742_vm2, %v738_v1  ;;  %v995_v5 = vmul.f32 0.35355338, %v826_v2 }
  0xf5   : > { %1781 = vst.msk [vmem:[%s2642_s28 + $0x8] sm:$0xff] %vm742_vm2, %v995_v5 }
  0xfa   : > { %v908_v8 = vpop.f32.mrf.mxu0  ;;  %v991_v9 = vpop.f32.mrf.mxu1 }
  0xfb   : > { %v909_v10 = vadd.f32 %v1772_v6, %v908_v8  ;;  %v992_v11 = vadd.f32 %v1779_v7, %v991_v9 }
  0xfc   : > { %v1960_v12 = vpop.f32.mrf.mxu0  ;;  %v1971_v13 = vpop.f32.mrf.mxu1 }
  0xfd   : > { %1782 = vst.msk [vmem:[%s2638_s26 + $0x8] sm:$0xff] %vm742_vm2, %v909_v10  ;;  %1783 = vst.msk [vmem:[%s2652_s12 + $0x8] sm:$0xff] %vm742_vm2, %v992_v11 }
 0x104   : > { %v1081_v16 = vpop.f32.mrf.mxu0  ;;  %v1164_v17 = vpop.f32.mrf.mxu1 }
 0x105   : > { %v1082_v18 = vadd.f32 %v1789_v14, %v1081_v16  ;;  %v1165_v19 = vadd.f32 %v1796_v15, %v1164_v17 }
 0x106   : > { %v1982_v20 = vpop.f32.mrf.mxu0  ;;  %v1993_v21 = vpop.f32.mrf.mxu1 }
 0x107   : > { %v1251_v22 = vmul.f32 0.35355338, %v1082_v18  ;;  %1806 = vst.msk [vmem:[%s2638_s26 + $0x10] sm:$0xff] %vm742_vm2, %v1165_v19 }
 0x109   : > { %1805 = vst.msk [vmem:[%s2642_s28 + $0x10] sm:$0xff] %vm742_vm2, %v1251_v22 }
 0x10e   : > { %v1247_v25 = vpop.f32.mrf.mxu0  ;;  %v1337_v26 = vpop.f32.mrf.mxu1 }
 0x10f   : > { %v1248_v27 = vadd.f32 %v1803_v23, %v1247_v25  ;;  %v1338_v28 = vadd.f32 %v1813_v24, %v1337_v26 }
 0x110   : > { %v2004_v29 = vpop.f32.mrf.mxu0  ;;  %v2015_v30 = vpop.f32.mrf.mxu1 }
 0x111   : > { %1807 = vst.msk [vmem:[%s2652_s12 + $0x10] sm:$0xff] %vm742_vm2, %v1248_v27  ;;  %v1507_v31 = vmul.f32 0.35355338, %v1338_v28 }
 0x113   : > { %1829 = vst.msk [vmem:[%s2642_s28 + $0x18] sm:$0xff] %vm742_vm2, %v1507_v31 }
 0x114   : > { %2120 = shalt.err (!%p2117_p5)
}
 0x115   : > { %s2121_s23 = scalar_lea.hbm %s2696_s25, 512  ;;  %s2125_s24 = scalar_lea.hbm %s2844_s9, 1024 }
 0x116   : > { %p2122_p6 = scmp.ne.s32.totalorder %s2696_s25, %s2121_s23  ;;  %p2126_p10 = scmp.lt.s32.totalorder %s2696_s25, %s2844_s9 }
 0x117   : > { %p2127_p11 = scmp.lt.s32.totalorder %s2125_s24, %s2121_s23 }
 0x118   : > { %p2123_p7 = pnand %p2122_p6, %p2350_p4 }
 0x119   : > { %p2128_p12 = por %p2127_p11, %p2126_p10 }
 0x11a   : > { %p2124_p9 = pneg %p2123_p7 }
 0x11c   : > { %p2129_p13 = pnand %p2128_p12, %p2124_p9 }
 0x11e   : > { %2132 = shalt.err (!%p2129_p13)
}
 0x11f   : > { %s2851_s0 = smov 128   ;;  %s2245_s1 = smov 8   ;;  %v1820_v32 = vld [vmem:[%s2841_s6 + $0x3] ss:$0 sm:$0xff]  ;;  %v1420_v34 = vpop.f32.mrf.mxu0  ;;  %v1503_v35 = vpop.f32.mrf.mxu1 }
 0x120   : > { %2038 = dma.vmem_to_hbm [thread:$0]  (%p2350_p4), %s2688_s14, 512, %s2696_s25, %s2702_s20, %s2851_s0, %s2851_s0, %s2245_s1   ;;  %v1421_v36 = vadd.f32 %v1820_v32, %v1420_v34 }
 0x121   : > { %s1556_s2 = sshll.u32 %s2638_s26, 4  ;;  %v1827_v33 = vld [vmem:[%s2843_s8 + $0x3] ss:$0 sm:$0xff]  ;;  %s2865_s24 = sadd.s32 4294967295, %s2239_s22   ;;  %v2026_v38 = vpop.f32.mrf.mxu0  ;;  %v2037_v39 = vpop.f32.mrf.mxu1  ;;  %s2740_s2 = int_to_ptr.vmem [resolvable:$true] %s1556_s2 }
 0x122   : > { %s2737_s15 = sand.u32 1, %s2865_s24   ;;  %s1573_s3 = sshll.u32 %s2652_s12, 4  ;;  %v1504_v37 = vadd.f32 %v1827_v33, %v1503_v35  ;;  %1830 = vst.msk [vmem:[%s2638_s26 + $0x18] sm:$0xff] %vm742_vm2, %v1421_v36  ;;  %s2748_s3 = int_to_ptr.vmem [resolvable:$true] %s1573_s3 }
 0x123   : > { %s2746_s20 = scalar_lea.hbm %s2845_s10, %s2686_s16  ;;  %s2754_s28 = scalar_lea.hbm %s2846_s11, %s2686_s16 }
 0x124   : > { %1831 = vst.msk [vmem:[%s2652_s12 + $0x18] sm:$0xff] %vm742_vm2, %v1504_v37  ;;  %s1520_s21 = scalar_lea.sflag [#allocation5], %s2737_s15  ;;  %s2133_s24 = scalar_lea.vmem %s2740_s2, 512 }
 0x125   : > { %p2134_p0 = scmp.ne.s32.totalorder %s2740_s2, %s2133_s24  ;;  %s2246_s14 = smov [#allocation4]  }
 0x126   : > { %s2137_s25 = sshll.u32 %s2246_s14, 4  ;;  %s2138_s25 = int_to_ptr.vmem [resolvable:$false] %s2137_s25 }
 0x127   : > { %p2135_p1 = pnand %p2134_p0, %p2350_p4  ;;  %s2139_s0 = scalar_lea.vmem %s2138_s25, 1024 }
 0x128   : > { %p2140_p3 = scmp.lt.s32.totalorder %s2740_s2, %s2138_s25  ;;  %p2141_p5 = scmp.lt.s32.totalorder %s2139_s0, %s2133_s24 }
 0x129   : > { %p2136_p2 = pneg %p2135_p1 }
 0x12a   : > { %p2142_p6 = por %p2141_p5, %p2140_p3 }
 0x12c   : > { %p2143_p7 = pnand %p2142_p6, %p2136_p2 }
 0x12e   : > { %2146 = shalt.err (!%p2143_p7)
}
 0x12f   : > { %s2147_s26 = scalar_lea.hbm %s2746_s20, 512  ;;  %s2151_s13 = scalar_lea.hbm %s2845_s10, 1024 }
 0x130   : > { %p2148_p9 = scmp.ne.s32.totalorder %s2746_s20, %s2147_s26  ;;  %p2152_p12 = scmp.lt.s32.totalorder %s2746_s20, %s2845_s10 }
 0x131   : > { %p2153_p13 = scmp.lt.s32.totalorder %s2151_s13, %s2147_s26 }
 0x132   : > { %p2149_p10 = pnand %p2148_p9, %p2350_p4 }
 0x133   : > { %p2154_p0 = por %p2153_p13, %p2152_p12 }
 0x134   : > { %p2150_p11 = pneg %p2149_p10 }
 0x136   : > { %p2155_p1 = pnand %p2154_p0, %p2150_p11 }
 0x138   : > { %2158 = shalt.err (!%p2155_p1)
}
 0x139   : > { %s2866_s0 = smov 128   ;;  %s2159_s24 = scalar_lea.vmem %s2748_s3, 512 }
 0x13a   : > { %2039 = dma.vmem_to_hbm [thread:$0]  (%p2350_p4), %s2740_s2, 512, %s2746_s20, %s1520_s21, %s2866_s0, %s2866_s0, %s2245_s1  }
 0x13b   : > { %p2160_p2 = scmp.ne.s32.totalorder %s2748_s3, %s2159_s24  ;;  %s2247_s25 = smov [#allocation6]  }
 0x13c   : > { %s2163_s26 = sshll.u32 %s2247_s25, 4  ;;  %s2164_s26 = int_to_ptr.vmem [resolvable:$false] %s2163_s26 }
 0x13d   : > { %p2161_p3 = pnand %p2160_p2, %p2350_p4  ;;  %s2165_s12 = scalar_lea.vmem %s2164_s26, 1024 }
 0x13e   : > { %p2166_p6 = scmp.lt.s32.totalorder %s2748_s3, %s2164_s26  ;;  %p2167_p7 = scmp.lt.s32.totalorder %s2165_s12, %s2159_s24 }
 0x13f   : > { %p2162_p5 = pneg %p2161_p3 }
 0x140   : > { %p2168_p9 = por %p2167_p7, %p2166_p6 }
 0x142   : > { %p2169_p10 = pnand %p2168_p9, %p2162_p5 }
 0x144   : > { %2172 = shalt.err (!%p2169_p10)
}
 0x145   : > { %s2173_s16 = scalar_lea.hbm %s2754_s28, 512  ;;  %s2177_s13 = scalar_lea.hbm %s2846_s11, 1024 }
 0x146   : > { %p2174_p11 = scmp.ne.s32.totalorder %s2754_s28, %s2173_s16  ;;  %p2178_p0 = scmp.lt.s32.totalorder %s2754_s28, %s2846_s11 }
 0x147   : > { %p2179_p1 = scmp.lt.s32.totalorder %s2177_s13, %s2173_s16 }
 0x148   : > { %p2175_p12 = pnand %p2174_p11, %p2350_p4 }
 0x149   : > { %p2180_p2 = por %p2179_p1, %p2178_p0 }
 0x14a   : > { %p2176_p13 = pneg %p2175_p12 }
 0x14c   : > { %p2181_p3 = pnand %p2180_p2, %p2176_p13 }
 0x14e   : > { %2184 = shalt.err (!%p2181_p3)
}
 0x14f   : > { %2040 = dma.vmem_to_hbm [thread:$0]  (%p2350_p4), %s2748_s3, 512, %s2754_s28, %s1520_s21, %s2866_s0, %s2866_s0, %s2245_s1  }
 0x150 PF: > { %p2054_p5 = scmp.ge.s32.totalorder %s2239_s22, 2  ;;  %s1588_s24 = sand.u32 1, %s2219_s17  }
 0x151   : > { %s1589_s25 = scalar_lea.sflag [#allocation3], %s1588_s24 }
 0x152   : > { %p2045_p6 = pnand %p2054_p5, %p2359_p8 }
 0x154   : > { %p2046_p7 = pneg %p2045_p6 }
 0x156   : > { %2210 = dma.done.wait (%p2046_p7), %s1589_s25, 512  }
 0x157   : > { %2212 = vsyncadd (%p2046_p7), %s1589_s25, 4294966784  ;;  %s2867_s27 = sadd.s32 4294967294, %s2239_s22  }
 0x158   : > { %s1597_s26 = sand.u32 1, %s2867_s27  }
 0x159   : > { %s1598_s12 = scalar_lea.sflag [#allocation5], %s1597_s26 }
 0x15a   : > { %2214 = dma.done.wait (%p2046_p7), %s1598_s12, 1024  }
 0x15b   : > { %2216 = vsyncadd (%p2046_p7), %s1598_s12, 4294966272  ;;  %s28_s22 = sadd.s32 1, %s2239_s22   ;;  %s2868_s20 = sld [smem:[#allocation9_spill]] }
 0x15c   : > { %p25_p4 = scmp.ge.s32.totalorder %s28_s22, 4   ;;  %s2869_s21 = sld [smem:[#allocation10_spill]] }
 0x15d   : > { %s2870_s17 = smov %s2223_s18  ;;  %s2871_s18 = smov %s2227_s19 }
 0x15e   : > { %s2872_s19 = smov %s2365_s30  ;;  %27 = sbr.rel (!%p25_p4) target bundleno = 11 (0xb), region = 156 }
 0x163   :  { %1612 = vsyncpa [#allocation3], 1 }
 0x164   :  { %1614 = vsyncpa [#allocation3 + $0x1], 1 }
 0x165   :  { %1615 = vsyncpa [#allocation5], 1 }
 0x166   :  { %1617 = vsyncpa [#allocation5 + $0x1], 1 }

</bundles_post_ra>
